<compile_context>
chip_gen: v5e
topology: v5e:2x2
jax: 0.10.0
libtpu: 0.0.40
codegen_flags: <defaults>
</compile_context>

<pallas_src>
import math

import jax
import jax.numpy as jnp
from jax.experimental import pallas as pl
from jax.experimental.pallas import tpu as pltpu


def _round_up(n, m):
    return (n + m - 1) // m * m


def _cdiv(a, b):
    return (a + b - 1) // b


def value_net_kernel(xa_ref, w1_ref, b1_ref, w2s_ref, w2a_ref, b2_ref,
                     w3_ref, out_ref):
    xa = xa_ref[...]                         # (TB, D_IN) bf16, [x | a | 0-pad]

    # fc1 + ReLU.  w1 rows for the action / pad columns are zero, so
    # xa @ w1 == x @ W1 exactly.
    h1 = jnp.dot(xa, w1_ref[...],
                 preferred_element_type=jnp.float32) + b1_ref[...]
    h1 = jnp.maximum(h1, 0.0)

    # fc2 on concat([h1, a], 1), folded as two matmuls, + ReLU.  w2a rows
    # outside the action columns are zero, so xa @ w2a == a @ W2[400:] exactly.
    h2 = (jnp.dot(h1.astype(jnp.bfloat16), w2s_ref[...],
                  preferred_element_type=jnp.float32)
          + jnp.dot(xa, w2a_ref[...], preferred_element_type=jnp.float32)
          + b2_ref[...])
    h2 = jnp.maximum(h2, 0.0)

    # fc3 (out_features = 1): VPU multiply, then fold the h2p lanes down to a
    # lane-dense 128-wide f32 partial using vreg-aligned slices + VPU adds
    # (no XLU cross-lane reduce, no masked (tb, 1) store).  The final 128-lane
    # sum and the +b3 are finished in the wrapper on the lane-dense slab.
    p = h2 * w3_ref[...]                     # (TB, h2p) f32, pad lanes are 0
    h2p = w3_ref.shape[1]
    partial = p[:, 0:128]
    for c in range(1, h2p // 128):
        partial = partial + p[:, c * 128:(c + 1) * 128]
    out_ref[...] = partial                   # (TB, 128) f32, unmasked vst


def value_net_forward(x, a, kernel_params, *, block_b=2048):
    """x: (B, state_dim) f32, a: (B, action_dim) f32 -> (B, 1) f32."""
    B, state_dim = x.shape
    action_dim = a.shape[1]
    w1p, b1p, w2sp, w2ap, b2p, w3p, b3 = kernel_params
    d_in = w1p.shape[0]        # lane-padded state_dim + action_dim (128)
    h1p = w1p.shape[1]         # 512
    h2p = w2sp.shape[1]        # 384

    # Batch tiling: at least 2 tiles once B > 16 (keeps both v7x TCs busy
    # under dimension_semantics=("parallel",)); tile size picked to minimize
    # last-tile padding; rows rounded to the sublane multiple of 8.
    n_tiles = max(_cdiv(B, block_b), 2 if B > 16 else 1)
    tb = _round_up(_cdiv(B, n_tiles), 8)
    bp = _round_up(B, tb)
    grid = (bp // tb,)

    # Assemble xa = [x | a | 0-pad] directly in bf16 with a fusable concat/pad
    # (no zeros().at[].set() HBM round trip).  This is the only per-sample
    # HBM stream into the kernel; bf16 halves it and the double-buffered VMEM.
    xa = jnp.concatenate([x, a], axis=1).astype(jnp.bfloat16)
    xa = jnp.pad(xa, ((0, bp - B), (0, d_in - (state_dim + action_dim))))

    flops = 2 * bp * (d_in * h1p + h1p * h2p + d_in * h2p) + 4 * bp * h2p
    bytes_accessed = (xa.size * 2                                  # bf16 activations in
                      + (w1p.size + w2sp.size + w2ap.size) * 2     # bf16 weights
                      + (b1p.size + b2p.size + w3p.size) * 4       # f32 bias/row
                      + bp * 128 * 4)                              # lane-dense partial out

    partial = pl.pallas_call(
        value_net_kernel,
        out_shape=jax.ShapeDtypeStruct((bp, 128), jnp.float32),
        grid=grid,
        in_specs=[
            pl.BlockSpec((tb, d_in), lambda i: (i, 0)),      # xa (streamed, bf16)
            # Constant index_maps: weight/bias tiles are DMA'd once per
            # pallas_call and stay VMEM-resident across all grid steps.
            pl.BlockSpec((d_in, h1p), lambda i: (0, 0)),     # w1
            pl.BlockSpec((1, h1p), lambda i: (0, 0)),        # b1
            pl.BlockSpec((h1p, h2p), lambda i: (0, 0)),      # w2s
            pl.BlockSpec((d_in, h2p), lambda i: (0, 0)),     # w2a
            pl.BlockSpec((1, h2p), lambda i: (0, 0)),        # b2
            pl.BlockSpec((1, h2p), lambda i: (0, 0)),        # w3 row
        ],
        out_specs=pl.BlockSpec((tb, 128), lambda i: (i, 0)),
        compiler_params=pltpu.CompilerParams(
            dimension_semantics=("parallel",),
            vmem_limit_bytes=32 * 1024 * 1024),
        cost_estimate=pl.CostEstimate(flops=flops, transcendentals=0,
                                      bytes_accessed=bytes_accessed),
    )(xa, w1p, b1p, w2sp, w2ap, b2p, w3p)

    # Final 128-lane reduce + bias on the lane-dense partial.  Padded batch
    # rows contain garbage and are sliced off BEFORE any reduction.
    return jnp.sum(partial[:B], axis=-1, keepdims=True) + b3[0, 0]


def init_value_net_params(key, state_dim, action_dim):
    """Deterministic init mirroring the module: uniform(-w, w) per layer.

    Returns logical (unpadded, f32) params:
      w1 (state_dim,400), b1 (1,400), w2s (400,300), w2a (action_dim,300),
      b2 (1,300), w3_row (1,300), b3 (1,1)
    """
    h1, h2 = 400, 300
    k1w, k1b, k2w, k2b, k3w, k3b = jax.random.split(key, 6)

    w = 1.0 / math.sqrt(state_dim)
    w1 = jax.random.uniform(k1w, (state_dim, h1), jnp.float32, -w, w)
    b1 = jax.random.uniform(k1b, (1, h1), jnp.float32, -w, w)

    w = 1.0 / math.sqrt(h1 + action_dim)
    w2 = jax.random.uniform(k2w, (h1 + action_dim, h2), jnp.float32, -w, w)
    b2 = jax.random.uniform(k2b, (1, h2), jnp.float32, -w, w)
    w2s = w2[:h1, :]
    w2a = w2[h1:, :]

    w = 0.003
    w3_row = jax.random.uniform(k3w, (1, h2), jnp.float32, -w, w)
    b3 = jax.random.uniform(k3b, (1, 1), jnp.float32, -w, w)

    return (w1, b1, w2s, w2a, b2, w3_row, b3)


def prepare_kernel_params(params, state_dim, action_dim):
    """Zero-pad to lane-dense shapes, fold the concat, cast MXU weights to bf16."""
    w1, b1, w2s, w2a, b2, w3_row, b3 = params
    h1, h2 = w1.shape[1], w2s.shape[1]
    d_in = _round_up(state_dim + action_dim, 128)   # 23 -> 128
    h1p = _round_up(h1, 128)                        # 400 -> 512
    h2p = _round_up(h2, 128)                        # 300 -> 384

    w1p = jnp.zeros((d_in, h1p), jnp.float32).at[:state_dim, :h1].set(w1)
    w2ap = jnp.zeros((d_in, h2p), jnp.float32).at[
        state_dim:state_dim + action_dim, :h2].set(w2a)
    w2sp = jnp.zeros((h1p, h2p), jnp.float32).at[:h1, :h2].set(w2s)
    b1p = jnp.zeros((1, h1p), jnp.float32).at[:, :h1].set(b1)
    b2p = jnp.zeros((1, h2p), jnp.float32).at[:, :h2].set(b2)
    w3p = jnp.zeros((1, h2p), jnp.float32).at[:, :h2].set(w3_row)

    # bf16 weights feed the MXU (f32 accumulation); biases / fc3 row stay f32.
    return (w1p.astype(jnp.bfloat16), b1p,
            w2sp.astype(jnp.bfloat16), w2ap.astype(jnp.bfloat16), b2p,
            w3p, b3)


if __name__ == "__main__":
    # Walker2d-v5: observation dim 17, action dim 6; small batch for testing.
    state_dim, action_dim, batch = 17, 6, 2

    key = jax.random.PRNGKey(0)
    kx, ka, kp = jax.random.split(key, 3)

    x = jax.random.normal(kx, (batch, state_dim), jnp.float32)
    a = jax.random.uniform(ka, (batch, action_dim), jnp.float32, -1.0, 1.0)

    params = init_value_net_params(kp, state_dim, action_dim)
    kparams = prepare_kernel_params(params, state_dim, action_dim)

    q = value_net_forward(x, a, kparams)
    jax.block_until_ready(q)

    # Matched-precision pure-JAX reference (same bf16 inputs/weights, f32 accum).
    w1, b1, w2s, w2a, b2, w3_row, b3 = params
    bf = jnp.bfloat16
    h1 = jnp.maximum(
        jnp.dot(x.astype(bf), w1.astype(bf),
                preferred_element_type=jnp.float32) + b1, 0.0)
    h2 = jnp.maximum(
        jnp.dot(h1.astype(bf), w2s.astype(bf),
                preferred_element_type=jnp.float32)
        + jnp.dot(a.astype(bf), w2a.astype(bf),
                  preferred_element_type=jnp.float32)
        + b2, 0.0)
    q_ref = jnp.sum(h2 * w3_row, axis=-1, keepdims=True) + b3[0, 0]

    assert q.shape == (batch, 1)
    assert jnp.allclose(q, q_ref, atol=1e-3, rtol=1e-3), (q, q_ref)

    print("KERNEL_OK")
</pallas_src>

<mosaic_0001>
module attributes {stable_mosaic.version = 11 : i64} {
  func.func @value_net_kernel(%arg0: i32, %arg1: memref<8x128xbf16, #tpu.memory_space<vmem>>, %arg2: memref<128x512xbf16, #tpu.memory_space<vmem>>, %arg3: memref<1x512xf32, #tpu.memory_space<vmem>>, %arg4: memref<512x384xbf16, #tpu.memory_space<vmem>>, %arg5: memref<128x384xbf16, #tpu.memory_space<vmem>>, %arg6: memref<1x384xf32, #tpu.memory_space<vmem>>, %arg7: memref<1x384xf32, #tpu.memory_space<vmem>>, %arg8: memref<8x128xf32, #tpu.memory_space<vmem>>) attributes {dimension_semantics = [#tpu.dimension_semantics<parallel>], iteration_bounds = array<i64: 1>, scalar_prefetch = 0 : i64, scratch_operands = 0 : i64, tpu.core_type = #tpu.core_type<tc>, window_params = [{transform_indices = @transform_0, window_bounds = array<i64: 8, 128>}, {pipeline_mode = #tpu.pipeline_mode<synchronous>, transform_indices = @transform_1, window_bounds = array<i64: 128, 512>}, {pipeline_mode = #tpu.pipeline_mode<synchronous>, transform_indices = @transform_2, window_bounds = array<i64: 1, 512>}, {pipeline_mode = #tpu.pipeline_mode<synchronous>, transform_indices = @transform_3, window_bounds = array<i64: 512, 384>}, {pipeline_mode = #tpu.pipeline_mode<synchronous>, transform_indices = @transform_4, window_bounds = array<i64: 128, 384>}, {pipeline_mode = #tpu.pipeline_mode<synchronous>, transform_indices = @transform_5, window_bounds = array<i64: 1, 384>}, {pipeline_mode = #tpu.pipeline_mode<synchronous>, transform_indices = @transform_6, window_bounds = array<i64: 1, 384>}, {transform_indices = @transform_7, window_bounds = array<i64: 8, 128>}]} {
    %c0 = arith.constant 0 : index
    %c0_0 = arith.constant 0 : index
    %0 = vector.load %arg1[%c0, %c0_0] : memref<8x128xbf16, #tpu.memory_space<vmem>>, vector<8x128xbf16>
    %c0_1 = arith.constant 0 : index
    %c0_2 = arith.constant 0 : index
    %1 = vector.load %arg2[%c0_1, %c0_2] : memref<128x512xbf16, #tpu.memory_space<vmem>>, vector<128x512xbf16>
    %cst = arith.constant dense<0.000000e+00> : vector<8x512xf32>
    %2 = tpu.matmul %0, %1, %cst {dimension_numbers = #tpu.dot_dimension_numbers<[1], [0], [0], [1], [0, 0, 1, 1], [], []>} : vector<8x128xbf16>, vector<128x512xbf16>, vector<8x512xf32> -> vector<8x512xf32>
    %c0_3 = arith.constant 0 : index
    %c0_4 = arith.constant 0 : index
    %3 = vector.load %arg3[%c0_3, %c0_4] : memref<1x512xf32, #tpu.memory_space<vmem>>, vector<1x512xf32>
    %4 = vector.broadcast %3 : vector<1x512xf32> to vector<8x512xf32>
    %5 = arith.addf %2, %4 : vector<8x512xf32>
    %cst_5 = arith.constant 0.000000e+00 : f32
    %6 = vector.broadcast %cst_5 : f32 to vector<8x512xf32>
    %7 = arith.maximumf %5, %6 : vector<8x512xf32>
    %8 = arith.truncf %7 : vector<8x512xf32> to vector<8x512xbf16>
    %c0_6 = arith.constant 0 : index
    %c0_7 = arith.constant 0 : index
    %9 = vector.load %arg4[%c0_6, %c0_7] : memref<512x384xbf16, #tpu.memory_space<vmem>>, vector<512x384xbf16>
    %cst_8 = arith.constant dense<0.000000e+00> : vector<8x384xf32>
    %10 = tpu.matmul %8, %9, %cst_8 {dimension_numbers = #tpu.dot_dimension_numbers<[1], [0], [0], [1], [0, 0, 1, 1], [], []>} : vector<8x512xbf16>, vector<512x384xbf16>, vector<8x384xf32> -> vector<8x384xf32>
    %c0_9 = arith.constant 0 : index
    %c0_10 = arith.constant 0 : index
    %11 = vector.load %arg5[%c0_9, %c0_10] : memref<128x384xbf16, #tpu.memory_space<vmem>>, vector<128x384xbf16>
    %cst_11 = arith.constant dense<0.000000e+00> : vector<8x384xf32>
    %12 = tpu.matmul %0, %11, %cst_11 {dimension_numbers = #tpu.dot_dimension_numbers<[1], [0], [0], [1], [0, 0, 1, 1], [], []>} : vector<8x128xbf16>, vector<128x384xbf16>, vector<8x384xf32> -> vector<8x384xf32>
    %13 = arith.addf %10, %12 : vector<8x384xf32>
    %c0_12 = arith.constant 0 : index
    %c0_13 = arith.constant 0 : index
    %14 = vector.load %arg6[%c0_12, %c0_13] : memref<1x384xf32, #tpu.memory_space<vmem>>, vector<1x384xf32>
    %15 = vector.broadcast %14 : vector<1x384xf32> to vector<8x384xf32>
    %16 = arith.addf %13, %15 : vector<8x384xf32>
    %cst_14 = arith.constant 0.000000e+00 : f32
    %17 = vector.broadcast %cst_14 : f32 to vector<8x384xf32>
    %18 = arith.maximumf %16, %17 : vector<8x384xf32>
    %c0_15 = arith.constant 0 : index
    %c0_16 = arith.constant 0 : index
    %19 = vector.load %arg7[%c0_15, %c0_16] : memref<1x384xf32, #tpu.memory_space<vmem>>, vector<1x384xf32>
    %20 = vector.broadcast %19 : vector<1x384xf32> to vector<8x384xf32>
    %21 = arith.mulf %18, %20 : vector<8x384xf32>
    %22 = vector.extract_strided_slice %21 {offsets = [0, 0], sizes = [8, 128], strides = [1, 1]} : vector<8x384xf32> to vector<8x128xf32>
    %23 = vector.extract_strided_slice %21 {offsets = [0, 128], sizes = [8, 128], strides = [1, 1]} : vector<8x384xf32> to vector<8x128xf32>
    %24 = arith.addf %22, %23 : vector<8x128xf32>
    %25 = vector.extract_strided_slice %21 {offsets = [0, 256], sizes = [8, 128], strides = [1, 1]} : vector<8x384xf32> to vector<8x128xf32>
    %26 = arith.addf %24, %25 : vector<8x128xf32>
    %c0_17 = arith.constant 0 : index
    %c0_18 = arith.constant 0 : index
    %27 = vector.load %arg8[%c0_17, %c0_18] : memref<8x128xf32, #tpu.memory_space<vmem>>, vector<8x128xf32>
    tpu.vector_store %arg8[%c0_17, %c0_18], %26 {strides = array<i32>} : memref<8x128xf32, #tpu.memory_space<vmem>>, vector<8x128xf32>,
    return
  }
  func.func @transform_0(%arg0: i32) -> (i32, i32) {
    %c0_i32 = arith.constant 0 : i32
    %c0_i32_0 = arith.constant 0 : i32
    return %arg0, %c0_i32 : i32, i32
  }
  func.func @transform_1(%arg0: i32) -> (i32, i32) {
    %c0_i32 = arith.constant 0 : i32
    %c0_i32_0 = arith.constant 0 : i32
    %c0_i32_1 = arith.constant 0 : i32
    return %c0_i32, %c0_i32_0 : i32, i32
  }
  func.func @transform_2(%arg0: i32) -> (i32, i32) {
    %c0_i32 = arith.constant 0 : i32
    %c0_i32_0 = arith.constant 0 : i32
    %c0_i32_1 = arith.constant 0 : i32
    return %c0_i32, %c0_i32_0 : i32, i32
  }
  func.func @transform_3(%arg0: i32) -> (i32, i32) {
    %c0_i32 = arith.constant 0 : i32
    %c0_i32_0 = arith.constant 0 : i32
    %c0_i32_1 = arith.constant 0 : i32
    return %c0_i32, %c0_i32_0 : i32, i32
  }
  func.func @transform_4(%arg0: i32) -> (i32, i32) {
    %c0_i32 = arith.constant 0 : i32
    %c0_i32_0 = arith.constant 0 : i32
    %c0_i32_1 = arith.constant 0 : i32
    return %c0_i32, %c0_i32_0 : i32, i32
  }
  func.func @transform_5(%arg0: i32) -> (i32, i32) {
    %c0_i32 = arith.constant 0 : i32
    %c0_i32_0 = arith.constant 0 : i32
    %c0_i32_1 = arith.constant 0 : i32
    return %c0_i32, %c0_i32_0 : i32, i32
  }
  func.func @transform_6(%arg0: i32) -> (i32, i32) {
    %c0_i32 = arith.constant 0 : i32
    %c0_i32_0 = arith.constant 0 : i32
    %c0_i32_1 = arith.constant 0 : i32
    return %c0_i32, %c0_i32_0 : i32, i32
  }
  func.func @transform_7(%arg0: i32) -> (i32, i32) {
    %c0_i32 = arith.constant 0 : i32
    %c0_i32_0 = arith.constant 0 : i32
    return %arg0, %c0_i32 : i32, i32
  }
}

</mosaic_0001>

<bundles_post_ra>
// kernel: tpu_custom_call.1
= control target key start
LH: loop header
LB: loop body
LE: loop exit
PB: predicated region body
PF: predicated region fallthrough
CT: control target
= control target key end

     0   :  { %12 = vsyncpa [#allocation3], 0  ;;  %s2474_s0 = inlined_call_operand.hbm [shape: bf16[8,128], index: 0, kind: input, shape index: {}]   ;;  %s2475_s1 = inlined_call_operand.hbm [shape: bf16[128,512], index: 1, kind: input, shape index: {}]   ;;  %s2476_s2 = inlined_call_operand.hbm [shape: f32[1,512], index: 2, kind: input, shape index: {}]   ;;  %s2477_s3 = inlined_call_operand.hbm [shape: bf16[512,384], index: 3, kind: input, shape index: {}]   ;;  %s2478_s4 = inlined_call_operand.hbm [shape: bf16[128,384], index: 4, kind: input, shape index: {}]   ;;  %s2479_s5 = inlined_call_operand.vmem [shape: f32[1,384], index: 5, kind: input, shape index: {}]   ;;  %s2480_s6 = inlined_call_operand.hbm [shape: f32[1,384], index: 6, kind: input, shape index: {}]   ;;  %s2481_s7 = inlined_call_operand.hbm [shape: f32[8,128], index: 7, kind: output, shape index: {}]  }
   0x1   :  { %13 = vsyncpa [#allocation6], 0 }
   0x2   :  { %14 = vsyncpa [#allocation9], 0 }
   0x3   :  { %15 = vsyncpa [#allocation12], 0  ;;  %s32_s26 = sshll.u32 %s2475_s1, 4  ;;  %s33_s26 = int_to_ptr.hbm [resolvable:$true] %s32_s26 }
   0x4   :  { %16 = vsyncpa [#allocation4], 0  ;;  %s2370_s27 = smov [#allocation5]   ;;  %s56_s8 = sshll.u32 %s2477_s3, 4  ;;  %s57_s8 = int_to_ptr.hbm [resolvable:$true] %s56_s8 }
   0x5   :  { %s34_s28 = sshll.u32 %s2370_s27, 4  ;;  %s2371_s9 = smov 256   ;;  %s35_s28 = int_to_ptr.vmem [resolvable:$true] %s34_s28 }
   0x6   :  { %s2372_s10 = smov 16   ;;  %s2373_s11 = smov [#allocation8]  }
   0x7   :  { %40 = dma.hbm_to_vmem [thread:$0]  %s33_s26, 4096, %s35_s28, [#allocation6], %s2371_s9, %s2371_s9, %s2372_s10  }
   0x8   :  { %s58_s12 = sshll.u32 %s2373_s11, 4  ;;  %s2374_s13 = smov 192   ;;  %s59_s12 = int_to_ptr.vmem [resolvable:$true] %s58_s12 }
   0x9   :  { %s2375_s14 = smov 12   ;;  %s22_s16 = sshll.u32 %s2474_s0, 4  ;;  %s23_s16 = int_to_ptr.hbm [resolvable:$true] %s22_s16 }
   0xa   :  { %64 = dma.hbm_to_vmem [thread:$0]  %s57_s8, 12288, %s59_s12, [#allocation9], %s2374_s13, %s2374_s13, %s2375_s14  }
   0xb   :  { %s2376_s17 = smov [#allocation2]   ;;  %s46_s20 = sshll.u32 %s2476_s2, 4  ;;  %s47_s20 = int_to_ptr.hbm [resolvable:$true] %s46_s20 }
   0xc   :  { %s24_s18 = sshll.u32 %s2376_s17, 4  ;;  %s2377_s21 = smov [#allocation7]   ;;  %s25_s18 = int_to_ptr.vmem [resolvable:$true] %s24_s18 }
   0xd   :  { %27 = dma.hbm_to_vmem [thread:$0]  %s23_s16, 64, %s25_s18, [#allocation3]  }
   0xe   :  { %s48_s22 = sshll.u32 %s2377_s21, 4  ;;  %s69_s25 = sshll.u32 %s2478_s4, 4  ;;  %s49_s22 = int_to_ptr.vmem [resolvable:$true] %s48_s22  ;;  %s70_s25 = int_to_ptr.hbm [resolvable:$true] %s69_s25 }
   0xf   :  { %51 = dma.hbm_to_vmem [thread:$0]  %s47_s20, 64, %s49_s22, [#allocation6]  }
  0x10   :  { %s85_s27 = sshll.u32 %s2480_s6, 4  ;;  %s2378_s28 = smov [#allocation10]   ;;  %s86_s27 = int_to_ptr.hbm [resolvable:$true] %s85_s27 }
  0x11   :  { %s71_s29 = sshll.u32 %s2378_s28, 4  ;;  %s2379_s2 = smov [#allocation11]   ;;  %s72_s29 = int_to_ptr.vmem [resolvable:$true] %s71_s29 }
  0x12   :  { %77 = dma.hbm_to_vmem [thread:$0]  %s70_s25, 3072, %s72_s29, [#allocation9], %s2374_s13, %s2374_s13, %s2375_s14  }
  0x13   :  { %s87_s30 = sshll.u32 %s2379_s2, 4  ;;  %s88_s30 = int_to_ptr.vmem [resolvable:$true] %s87_s30 }
  0x14   :  { %90 = dma.hbm_to_vmem [thread:$0]  %s86_s27, 48, %s88_s30, [#allocation12]  }
  0x15   :  { %2360 = dma.done.wait [#allocation3], 64  }
  0x16   :  { %2361 = vsyncadd [#allocation3], 4294967232 }
  0x17   :  { %2362 = dma.done.wait [#allocation6], 4160  }
  0x18   :  { %2363 = vsyncadd [#allocation6], 4294963136 }
  0x19   :  { %2364 = dma.done.wait [#allocation9], 15360  }
  0x1a   :  { %2365 = vsyncadd [#allocation9], 4294951936 }
  0x1b   :  { %2366 = dma.done.wait [#allocation12], 48  }
  0x1c   :  { %2367 = vsyncadd [#allocation12], 4294967248  ;;  %v1535_v0 = vld [vmem:[#allocation5 + $0xe0] sm:$0xf]  ;;  %v2059_v1 = vld [vmem:[#allocation5 + $0xec] sm:$0xf0] }
  0x1d   :  { %v2057_v2 = vld [vmem:[#allocation5 + $0xe4] sm:$0xf]  ;;  %v1536_v3 = vor.u32 %v2059_v1, %v1535_v0  ;;  %v1537_v4 = vld [vmem:[#allocation5 + $0xf0] sm:$0xf0]  ;;  %v1543_v5 = vld [vmem:[#allocation5 + $0xe8] sm:$0xf] }
  0x1e   :  { %v2060_v6 = vld [vmem:[#allocation5 + $0xf4] sm:$0xf0]  ;;  %v1540_v7 = vor.u32 %v2057_v2, %v1537_v4  ;;  %v2058_v9 = vld [vmem:[#allocation5 + $0xec] sm:$0xf]  ;;  %v1545_v10 = vld [vmem:[#allocation5 + $0xf8] sm:$0xf0] }
  0x1f   :  { %v1544_v8 = vor.u32 %v2060_v6, %v1543_v5  ;;  %v1519_v11 = vld [vmem:[#allocation5 + $0xc0] sm:$0xf]  ;;  %318 = vmatpush.bf16.msra.mxu0 %v1536_v3  ;;  %v1548_v12 = vor.u32 %v2058_v9, %v1545_v10  ;;  %v2055_v13 = vld [vmem:[#allocation5 + $0xcc] sm:$0xf0]  ;;  %v2053_v14 = vld [vmem:[#allocation5 + $0xc4] sm:$0xf] }
  0x20   :  { %v1521_v15 = vld [vmem:[#allocation5 + $0xd0] sm:$0xf0]  ;;  %331 = vmatpush.bf16.msra.mxu1 %v1540_v7  ;;  %v1520_v16 = vor.u32 %v2055_v13, %v1519_v11  ;;  %v1527_v18 = vld [vmem:[#allocation5 + $0xc8] sm:$0xf]  ;;  %v2056_v19 = vld [vmem:[#allocation5 + $0xd4] sm:$0xf0] }
  0x21   :  { %344 = vmatpush.bf16.msra.mxu2 %v1544_v8  ;;  %v1524_v17 = vor.u32 %v2053_v14, %v1521_v15  ;;  %v2054_v20 = vld [vmem:[#allocation5 + $0xcc] sm:$0xf]  ;;  %357 = vmatpush.bf16.msra.mxu3 %v1548_v12  ;;  %v1528_v21 = vor.u32 %v2056_v19, %v1527_v18  ;;  %v1529_v22 = vld [vmem:[#allocation5 + $0xd8] sm:$0xf0]  ;;  %v1503_v23 = vld [vmem:[#allocation5 + $0xa0] sm:$0xf] }
  0x22   :  { %v2051_v24 = vld [vmem:[#allocation5 + $0xac] sm:$0xf0]  ;;  %v1532_v25 = vor.u32 %v2054_v20, %v1529_v22  ;;  %v2049_v26 = vld [vmem:[#allocation5 + $0xa4] sm:$0xf]  ;;  %v1505_v27 = vld [vmem:[#allocation5 + $0xb0] sm:$0xf0] }
  0x23   :  { %v1511_v28 = vld [vmem:[#allocation5 + $0xa8] sm:$0xf]  ;;  %319 = vmatpush.bf16.msra.mxu0 %v1520_v16  ;;  %v1504_v29 = vor.u32 %v2051_v24, %v1503_v23  ;;  %v2052_v30 = vld [vmem:[#allocation5 + $0xb4] sm:$0xf0]  ;;  %v2050_v31 = vld [vmem:[#allocation5 + $0xac] sm:$0xf]  ;;  %v1508_v33 = vor.u32 %v2049_v26, %v1505_v27 }
  0x24   :  { %v1513_v32 = vld [vmem:[#allocation5 + $0xb8] sm:$0xf0]  ;;  %332 = vmatpush.bf16.msra.mxu1 %v1524_v17  ;;  %v1512_v34 = vor.u32 %v2052_v30, %v1511_v28  ;;  %v1487_v35 = vld [vmem:[#allocation5 + $0x80] sm:$0xf]  ;;  %v2047_v36 = vld [vmem:[#allocation5 + $0x8c] sm:$0xf0] }
  0x25   :  { %345 = vmatpush.bf16.msra.mxu2 %v1528_v21  ;;  %v2045_v37 = vld [vmem:[#allocation5 + $0x84] sm:$0xf]  ;;  %358 = vmatpush.bf16.msra.mxu3 %v1532_v25  ;;  %v1516_v38 = vor.u32 %v2050_v31, %v1513_v32  ;;  %v1489_v39 = vld [vmem:[#allocation5 + $0x90] sm:$0xf0]  ;;  %v1495_v40 = vld [vmem:[#allocation5 + $0x88] sm:$0xf]  ;;  %v1488_v44 = vor.u32 %v2047_v36, %v1487_v35 }
  0x26   :  { %v2048_v41 = vld [vmem:[#allocation5 + $0x94] sm:$0xf0]  ;;  %v2046_v42 = vld [vmem:[#allocation5 + $0x8c] sm:$0xf]  ;;  %v1497_v43 = vld [vmem:[#allocation5 + $0x98] sm:$0xf0]  ;;  %v1492_v45 = vor.u32 %v2045_v37, %v1489_v39 }
  0x27   :  { %320 = vmatpush.bf16.msra.mxu0 %v1504_v29  ;;  %v1496_v46 = vor.u32 %v2048_v41, %v1495_v40  ;;  %v1471_v47 = vld [vmem:[#allocation5 + $0x60] sm:$0xf]  ;;  %v2043_v48 = vld [vmem:[#allocation5 + $0x6c] sm:$0xf0]  ;;  %v2041_v49 = vld [vmem:[#allocation5 + $0x64] sm:$0xf]  ;;  %v1500_v50 = vor.u32 %v2046_v42, %v1497_v43 }
  0x28   :  { %333 = vmatpush.bf16.msra.mxu1 %v1508_v33  ;;  %v1473_v51 = vld [vmem:[#allocation5 + $0x70] sm:$0xf0]  ;;  %v1479_v52 = vld [vmem:[#allocation5 + $0x68] sm:$0xf]  ;;  %v2044_v53 = vld [vmem:[#allocation5 + $0x74] sm:$0xf0]  ;;  %v1472_v56 = vor.u32 %v2043_v48, %v1471_v47 }
  0x29   :  { %346 = vmatpush.bf16.msra.mxu2 %v1512_v34  ;;  %359 = vmatpush.bf16.msra.mxu3 %v1516_v38  ;;  %v2042_v54 = vld [vmem:[#allocation5 + $0x6c] sm:$0xf]  ;;  %v1481_v55 = vld [vmem:[#allocation5 + $0x78] sm:$0xf0]  ;;  %v1476_v57 = vor.u32 %v2041_v49, %v1473_v51  ;;  %v1480_v58 = vor.u32 %v2044_v53, %v1479_v52  ;;  %v1455_v59 = vld [vmem:[#allocation5 + $0x40] sm:$0xf] }
  0x2a   :  { %v2039_v60 = vld [vmem:[#allocation5 + $0x4c] sm:$0xf0]  ;;  %v2037_v61 = vld [vmem:[#allocation5 + $0x44] sm:$0xf]  ;;  %v1484_v62 = vor.u32 %v2042_v54, %v1481_v55  ;;  %v1457_v63 = vld [vmem:[#allocation5 + $0x50] sm:$0xf0] }
  0x2b   :  { %321 = vmatpush.bf16.msra.mxu0 %v1488_v44  ;;  %v1463_v0 = vld [vmem:[#allocation5 + $0x48] sm:$0xf]  ;;  %v2040_v1 = vld [vmem:[#allocation5 + $0x54] sm:$0xf0]  ;;  %v2038_v2 = vld [vmem:[#allocation5 + $0x4c] sm:$0xf]  ;;  %v1456_v4 = vor.u32 %v2039_v60, %v1455_v59  ;;  %v1460_v5 = vor.u32 %v2037_v61, %v1457_v63 }
  0x2c   :  { %334 = vmatpush.bf16.msra.mxu1 %v1492_v45  ;;  %v1465_v3 = vld [vmem:[#allocation5 + $0x58] sm:$0xf0]  ;;  %v1464_v6 = vor.u32 %v2040_v1, %v1463_v0  ;;  %v1439_v7 = vld [vmem:[#allocation5 + $0x20] sm:$0xf]  ;;  %v2035_v8 = vld [vmem:[#allocation5 + $0x2c] sm:$0xf0] }
  0x2d   :  { %347 = vmatpush.bf16.msra.mxu2 %v1496_v46  ;;  %360 = vmatpush.bf16.msra.mxu3 %v1500_v50  ;;  %v2033_v9 = vld [vmem:[#allocation5 + $0x24] sm:$0xf]  ;;  %v1468_v10 = vor.u32 %v2038_v2, %v1465_v3  ;;  %v1441_v11 = vld [vmem:[#allocation5 + $0x30] sm:$0xf0]  ;;  %v1447_v12 = vld [vmem:[#allocation5 + $0x28] sm:$0xf]  ;;  %v1440_v16 = vor.u32 %v2035_v8, %v1439_v7 }
  0x2e   :  { %v2036_v13 = vld [vmem:[#allocation5 + $0x34] sm:$0xf0]  ;;  %v2034_v14 = vld [vmem:[#allocation5 + $0x2c] sm:$0xf]  ;;  %v1449_v15 = vld [vmem:[#allocation5 + $0x38] sm:$0xf0]  ;;  %v1444_v18 = vor.u32 %v2033_v9, %v1441_v11 }
  0x2f   :  { %322 = vmatpush.bf16.msra.mxu0 %v1472_v56  ;;  %v1423_v17 = vld [vmem:[#allocation5] sm:$0xf]  ;;  %v1448_v19 = vor.u32 %v2036_v13, %v1447_v12  ;;  %v2031_v20 = vld [vmem:[#allocation5 + $0xc] sm:$0xf0]  ;;  %v2029_v21 = vld [vmem:[#allocation5 + $0x4] sm:$0xf]  ;;  %v1452_v23 = vor.u32 %v2034_v14, %v1449_v15 }
  0x30   :  { %335 = vmatpush.bf16.msra.mxu1 %v1476_v57  ;;  %v1425_v22 = vld [vmem:[#allocation5 + $0x10] sm:$0xf0]  ;;  %v1431_v24 = vld [vmem:[#allocation5 + $0x8] sm:$0xf]  ;;  %v2032_v25 = vld [vmem:[#allocation5 + $0x14] sm:$0xf0]  ;;  %v1424_v30 = vor.u32 %v2031_v20, %v1423_v17 }
  0x31   :  { %348 = vmatpush.bf16.msra.mxu2 %v1480_v58  ;;  %361 = vmatpush.bf16.msra.mxu3 %v1484_v62  ;;  %v2030_v26 = vld [vmem:[#allocation5 + $0xc] sm:$0xf]  ;;  %v1433_v27 = vld [vmem:[#allocation5 + $0x18] sm:$0xf0]  ;;  %v2179_v29 = vld [vmem:[#allocation10 + $0xb0] sm:$0xf0]  ;;  %v1428_v33 = vor.u32 %v2029_v21, %v1425_v22  ;;  %v1432_v34 = vor.u32 %v2032_v25, %v1431_v24 }
  0x32   :  { %v1635_v28 = vld [vmem:[#allocation10 + $0xa8] sm:$0xf]  ;;  %v2178_v31 = vld [vmem:[#allocation10 + $0xac] sm:$0xf]  ;;  %v1637_v32 = vld [vmem:[#allocation10 + $0xb4] sm:$0xf0]  ;;  %v1436_v35 = vor.u32 %v2030_v26, %v1433_v27 }
  0x33   :  { %323 = vmatpush.bf16.msra.mxu0 %v1456_v4  ;;  %v1636_v36 = vor.u32 %v2179_v29, %v1635_v28  ;;  %v1643_v37 = vld [vmem:[#allocation10 + $0xb0] sm:$0xf]  ;;  %v2180_v38 = vld [vmem:[#allocation10 + $0xb8] sm:$0xf0]  ;;  %v1640_v41 = vor.u32 %v2178_v31, %v1637_v32  ;;  %v2439_v42 = vld [vmem:[#allocation2] sm:$0xf] }
  0x34   :  { %336 = vmatpush.bf16.msra.mxu1 %v1460_v5  ;;  %v1623_v39 = vld [vmem:[#allocation10 + $0x90] sm:$0xf]  ;;  %v2176_v40 = vld [vmem:[#allocation10 + $0x98] sm:$0xf0]  ;;  %v2175_v43 = vld [vmem:[#allocation10 + $0x94] sm:$0xf]  ;;  %v1644_v45 = vor.u32 %v2180_v38, %v1643_v37 }
  0x35   :  { %349 = vmatpush.bf16.msra.mxu2 %v1464_v6  ;;  %362 = vmatpush.bf16.msra.mxu3 %v1468_v10  ;;  %v1625_v44 = vld [vmem:[#allocation10 + $0x9c] sm:$0xf0]  ;;  %v1624_v46 = vor.u32 %v2176_v40, %v1623_v39  ;;  %v1631_v47 = vld [vmem:[#allocation10 + $0x98] sm:$0xf]  ;;  %v2177_v48 = vld [vmem:[#allocation10 + $0xa0] sm:$0xf0] }
  0x36   :  { %v1611_v49 = vld [vmem:[#allocation10 + $0x78] sm:$0xf]  ;;  %v2173_v50 = vld [vmem:[#allocation10 + $0x80] sm:$0xf0]  ;;  %v1628_v51 = vor.u32 %v2175_v43, %v1625_v44  ;;  %v2172_v52 = vld [vmem:[#allocation10 + $0x7c] sm:$0xf]  ;;  %v1632_v56 = vor.u32 %v2177_v48, %v1631_v47 }
  0x37   :  { %324 = vmatpush.bf16.msra.mxu0 %v1440_v16  ;;  %v1613_v53 = vld [vmem:[#allocation10 + $0x84] sm:$0xf0]  ;;  %v2083_v55 = vld [vmem:[#allocation8 + $0xb0] sm:$0xf0]  ;;  %v1612_v58 = vor.u32 %v2173_v50, %v1611_v49  ;;  %v1619_v59 = vld [vmem:[#allocation10 + $0x80] sm:$0xf] }
  0x38   :  { %337 = vmatpush.bf16.msra.mxu1 %v1444_v18  ;;  %v1731_v54 = vld [vmem:[#allocation8 + $0xa8] sm:$0xf]  ;;  %v2174_v60 = vld [vmem:[#allocation10 + $0x88] sm:$0xf0]  ;;  %v1719_v61 = vld [vmem:[#allocation8 + $0x90] sm:$0xf]  ;;  %v1616_v0 = vor.u32 %v2172_v52, %v1613_v53 }
  0x39   :  { %350 = vmatpush.bf16.msra.mxu2 %v1448_v19  ;;  %363 = vmatpush.bf16.msra.mxu3 %v1452_v23  ;;  %v1732_v57 = vor.u32 %v2083_v55, %v1731_v54  ;;  %v1599_v62 = vld [vmem:[#allocation10 + $0x60] sm:$0xf]  ;;  %v2170_v63 = vld [vmem:[#allocation10 + $0x68] sm:$0xf0]  ;;  %v2080_v1 = vld [vmem:[#allocation8 + $0x98] sm:$0xf0]  ;;  %v1620_v5 = vor.u32 %v2174_v60, %v1619_v59 }
  0x3a   :  { %v2169_v2 = vld [vmem:[#allocation10 + $0x64] sm:$0xf]  ;;  %v1601_v3 = vld [vmem:[#allocation10 + $0x6c] sm:$0xf0]  ;;  %v1720_v4 = vor.u32 %v2080_v1, %v1719_v61  ;;  %v1600_v6 = vor.u32 %v2170_v63, %v1599_v62  ;;  %v1607_v7 = vld [vmem:[#allocation10 + $0x68] sm:$0xf] }
  0x3b   :  { %325 = vmatpush.bf16.msra.mxu0 %v1424_v30  ;;  %v2171_v8 = vld [vmem:[#allocation10 + $0x70] sm:$0xf0]  ;;  %v1707_v9 = vld [vmem:[#allocation8 + $0x78] sm:$0xf]  ;;  %v1587_v10 = vld [vmem:[#allocation10 + $0x48] sm:$0xf]  ;;  %v1604_v12 = vor.u32 %v2169_v2, %v1601_v3 }
  0x3c   :  { %338 = vmatpush.bf16.msra.mxu1 %v1428_v33  ;;  %v2167_v11 = vld [vmem:[#allocation10 + $0x50] sm:$0xf0]  ;;  %v2077_v13 = vld [vmem:[#allocation8 + $0x80] sm:$0xf0]  ;;  %v2166_v14 = vld [vmem:[#allocation10 + $0x4c] sm:$0xf]  ;;  %v1608_v17 = vor.u32 %v2171_v8, %v1607_v7 }
  0x3d   :  { %351 = vmatpush.bf16.msra.mxu2 %v1432_v34  ;;  %364 = vmatpush.bf16.msra.mxu3 %v1436_v35  ;;  %v1589_v15 = vld [vmem:[#allocation10 + $0x54] sm:$0xf0]  ;;  %v1708_v16 = vor.u32 %v2077_v13, %v1707_v9  ;;  %v1695_v18 = vld [vmem:[#allocation8 + $0x60] sm:$0xf]  ;;  %v2074_v19 = vld [vmem:[#allocation8 + $0x68] sm:$0xf0]  ;;  %v1588_v20 = vor.u32 %v2167_v11, %v1587_v10 }
  0x3e   :  { %326 = vmatmul.bf16.vlgmr.msra.gmra.mxu0 %v2439_v42  ;;  %v1595_v21 = vld [vmem:[#allocation10 + $0x50] sm:$0xf]  ;;  %v2168_v22 = vld [vmem:[#allocation10 + $0x58] sm:$0xf0]  ;;  %v1592_v25 = vor.u32 %v2166_v14, %v1589_v15  ;;  %v2163_v26 = vld [vmem:[#allocation10 + $0x34] sm:$0xf]  ;;  %v1696_v27 = vor.u32 %v2074_v19, %v1695_v18 }
  0x3f   :  { %666 = vmatpush.bf16.msrb.mxu0 %v1636_v36  ;;  %339 = vmatmul.bf16.vlgmr.msra.gmra.mxu1 %v2439_v42  ;;  %v1575_v23 = vld [vmem:[#allocation10 + $0x30] sm:$0xf]  ;;  %v2164_v24 = vld [vmem:[#allocation10 + $0x38] sm:$0xf0]  ;;  %v1577_v28 = vld [vmem:[#allocation10 + $0x3c] sm:$0xf0]  ;;  %v1596_v31 = vor.u32 %v2168_v22, %v1595_v21 }
  0x40   :  { %679 = vmatpush.bf16.msrb.mxu1 %v1640_v41  ;;  %352 = vmatmul.bf16.vlgmr.msra.gmra.mxu2 %v2439_v42  ;;  %v1683_v29 = vld [vmem:[#allocation8 + $0x48] sm:$0xf]  ;;  %v2071_v30 = vld [vmem:[#allocation8 + $0x50] sm:$0xf0]  ;;  %v1576_v32 = vor.u32 %v2164_v24, %v1575_v23  ;;  %v1583_v33 = vld [vmem:[#allocation10 + $0x38] sm:$0xf]  ;;  %v1580_v37 = vor.u32 %v2163_v26, %v1577_v28 }
  0x41   :  { %365 = vmatmul.bf16.vlgmr.msra.gmra.mxu3 %v2439_v42  ;;  %692 = vmatpush.bf16.msrb.mxu2 %v1644_v45  ;;  %v2165_v34 = vld [vmem:[#allocation10 + $0x40] sm:$0xf0]  ;;  %v1563_v35 = vld [vmem:[#allocation10 + $0x18] sm:$0xf]  ;;  %v2160_v38 = vld [vmem:[#allocation10 + $0x1c] sm:$0xf]  ;;  %v1684_v39 = vor.u32 %v2071_v30, %v1683_v29 }
  0x42   :  { %1217 = vmatpush.bf16.msrb.mxu3 %v1732_v57  ;;  %v2161_v36 = vld [vmem:[#allocation10 + $0x20] sm:$0xf0]  ;;  %v1565_v40 = vld [vmem:[#allocation10 + $0x24] sm:$0xf0]  ;;  %v1671_v41 = vld [vmem:[#allocation8 + $0x30] sm:$0xf]  ;;  %v1584_v44 = vor.u32 %v2165_v34, %v1583_v33 }
  0x43   :  { %667 = vmatpush.bf16.msrb.mxu0 %v1624_v46  ;;  %v2068_v43 = vld [vmem:[#allocation8 + $0x38] sm:$0xf0]  ;;  %v1564_v45 = vor.u32 %v2161_v36, %v1563_v35  ;;  %v1551_v46 = vld [vmem:[#allocation10] sm:$0xf]  ;;  %v2162_v48 = vld [vmem:[#allocation10 + $0x28] sm:$0xf0]  ;;  %v1568_v52 = vor.u32 %v2160_v38, %v1565_v40 }
  0x44   :  { %680 = vmatpush.bf16.msrb.mxu1 %v1628_v51  ;;  %v1571_v47 = vld [vmem:[#allocation10 + $0x20] sm:$0xf]  ;;  %v2158_v49 = vld [vmem:[#allocation10 + $0x8] sm:$0xf0]  ;;  %v1827_v50 = vld [vmem:[#allocation8 + $0x168] sm:$0xf]  ;;  %v1672_v53 = vor.u32 %v2068_v43, %v1671_v41 }
  0x45   :  { %693 = vmatpush.bf16.msrb.mxu2 %v1632_v56  ;;  %v2107_v51 = vld [vmem:[#allocation8 + $0x170] sm:$0xf0]  ;;  %v2157_v54 = vld [vmem:[#allocation10 + $0x4] sm:$0xf]  ;;  %v1553_v55 = vld [vmem:[#allocation10 + $0xc] sm:$0xf0]  ;;  %v1572_v57 = vor.u32 %v2162_v48, %v1571_v47  ;;  %v1552_v61 = vor.u32 %v2158_v49, %v1551_v46 }
  0x46   :  { %1218 = vmatpush.bf16.msrb.mxu3 %v1720_v4  ;;  %v1923_v56 = vld [vmem:[#allocation8 + $0x228] sm:$0xf]  ;;  %v1659_v59 = vld [vmem:[#allocation8 + $0x18] sm:$0xf]  ;;  %v2065_v60 = vld [vmem:[#allocation8 + $0x20] sm:$0xf0]  ;;  %v1556_v1 = vor.u32 %v2157_v54, %v1553_v55 }
  0x47   :  { %668 = vmatpush.bf16.msrb.mxu0 %v1612_v58  ;;  %v2131_v58 = vld [vmem:[#allocation8 + $0x230] sm:$0xf0]  ;;  %v1559_v62 = vld [vmem:[#allocation10 + $0x8] sm:$0xf]  ;;  %v1815_v4 = vld [vmem:[#allocation8 + $0x150] sm:$0xf]  ;;  %v1660_v7 = vor.u32 %v2065_v60, %v1659_v59 }
  0x48   :  { %681 = vmatpush.bf16.msrb.mxu1 %v1616_v0  ;;  %v2159_v63 = vld [vmem:[#allocation10 + $0x10] sm:$0xf0]  ;;  %v1828_v0 = vor.u32 %v2107_v51, %v1827_v50  ;;  %v2019_v2 = vld [vmem:[#allocation8 + $0x2e8] sm:$0xf]  ;;  %v1911_v9 = vld [vmem:[#allocation8 + $0x210] sm:$0xf] }
  0x49   :  { %694 = vmatpush.bf16.msrb.mxu2 %v1620_v5  ;;  %v2155_v3 = vld [vmem:[#allocation8 + $0x2f0] sm:$0xf0]  ;;  %v2104_v5 = vld [vmem:[#allocation8 + $0x158] sm:$0xf0]  ;;  %v1560_v8 = vor.u32 %v2159_v63, %v1559_v62  ;;  %v1647_v13 = vld [vmem:[#allocation8] sm:$0xf] }
  0x4a   :  { %1219 = vmatpush.bf16.msrb.mxu3 %v1708_v16  ;;  %v2128_v10 = vld [vmem:[#allocation8 + $0x218] sm:$0xf0]  ;;  %v2020_v11 = vor.u32 %v2155_v3, %v2019_v2  ;;  %v2062_v14 = vld [vmem:[#allocation8 + $0x8] sm:$0xf0]  ;;  %v1816_v15 = vor.u32 %v2104_v5, %v1815_v4  ;;  %v1733_v18 = vld [vmem:[#allocation8 + $0xb4] sm:$0xf0] }
  0x4b   :  { %669 = vmatpush.bf16.msrb.mxu0 %v1600_v6  ;;  %v1924_v6 = vor.u32 %v2131_v58, %v1923_v56  ;;  %v2152_v16 = vld [vmem:[#allocation8 + $0x2d8] sm:$0xf0]  ;;  %v1803_v19 = vld [vmem:[#allocation8 + $0x138] sm:$0xf]  ;;  %v1912_v21 = vor.u32 %v2128_v10, %v1911_v9  ;;  %v2125_v23 = vld [vmem:[#allocation8 + $0x200] sm:$0xf0]  ;;  %v1648_v24 = vor.u32 %v2062_v14, %v1647_v13 }
  0x4c   :  { %682 = vmatpush.bf16.msrb.mxu1 %v1604_v12  ;;  %v2007_v12 = vld [vmem:[#allocation8 + $0x2d0] sm:$0xf]  ;;  %v1899_v22 = vld [vmem:[#allocation8 + $0x1f8] sm:$0xf]  ;;  %v2149_v29 = vld [vmem:[#allocation8 + $0x2c0] sm:$0xf0] }
  0x4d   :  { %695 = vmatpush.bf16.msrb.mxu2 %v1608_v17  ;;  %v2082_v17 = vld [vmem:[#allocation8 + $0xac] sm:$0xf]  ;;  %v1995_v26 = vld [vmem:[#allocation8 + $0x2b8] sm:$0xf]  ;;  %v2079_v30 = vld [vmem:[#allocation8 + $0x94] sm:$0xf]  ;;  %v1900_v34 = vor.u32 %v2125_v23, %v1899_v22 }
  0x4e   :  { %1220 = vmatpush.bf16.msrb.mxu3 %v1696_v27  ;;  %v1736_v27 = vor.u32 %v2082_v17, %v1733_v18  ;;  %v2098_v33 = vld [vmem:[#allocation8 + $0x128] sm:$0xf0]  ;;  %v1887_v35 = vld [vmem:[#allocation8 + $0x1e0] sm:$0xf]  ;;  %v2076_v43 = vld [vmem:[#allocation8 + $0x7c] sm:$0xf] }
  0x4f   :  { %670 = vmatpush.bf16.msrb.mxu0 %v1588_v20  ;;  %v2101_v20 = vld [vmem:[#allocation8 + $0x140] sm:$0xf0]  ;;  %v2122_v36 = vld [vmem:[#allocation8 + $0x1e8] sm:$0xf0]  ;;  %v1983_v38 = vld [vmem:[#allocation8 + $0x2a0] sm:$0xf] }
  0x50   :  { %683 = vmatpush.bf16.msrb.mxu1 %v1592_v25  ;;  %v2008_v25 = vor.u32 %v2152_v16, %v2007_v12  ;;  %v1804_v28 = vor.u32 %v2101_v20, %v1803_v19  ;;  %v2146_v41 = vld [vmem:[#allocation8 + $0x2a8] sm:$0xf0]  ;;  %v2095_v46 = vld [vmem:[#allocation8 + $0x110] sm:$0xf0]  ;;  %v1888_v47 = vor.u32 %v2122_v36, %v1887_v35  ;;  %v1875_v48 = vld [vmem:[#allocation8 + $0x1c8] sm:$0xf] }
  0x51   :  { %696 = vmatpush.bf16.msrb.mxu2 %v1596_v31  ;;  %v1721_v31 = vld [vmem:[#allocation8 + $0x9c] sm:$0xf0]  ;;  %v2119_v49 = vld [vmem:[#allocation8 + $0x1d0] sm:$0xf0]  ;;  %v1971_v50 = vld [vmem:[#allocation8 + $0x288] sm:$0xf] }
  0x52   :  { %1221 = vmatpush.bf16.msrb.mxu3 %v1684_v39  ;;  %v1724_v39 = vor.u32 %v2079_v30, %v1721_v31  ;;  %v2073_v54 = vld [vmem:[#allocation8 + $0x64] sm:$0xf]  ;;  %v1697_v55 = vld [vmem:[#allocation8 + $0x6c] sm:$0xf0]  ;;  %v1876_v58 = vor.u32 %v2119_v49, %v1875_v48  ;;  %v2116_v60 = vld [vmem:[#allocation8 + $0x1b8] sm:$0xf0] }
  0x53   :  { %671 = vmatpush.bf16.msrb.mxu0 %v1576_v32  ;;  %v1791_v32 = vld [vmem:[#allocation8 + $0x120] sm:$0xf]  ;;  %v1767_v56 = vld [vmem:[#allocation8 + $0xf0] sm:$0xf]  ;;  %v1700_v63 = vor.u32 %v2073_v54, %v1697_v55  ;;  %v2070_v2 = vld [vmem:[#allocation8 + $0x4c] sm:$0xf] }
  0x54   :  { %684 = vmatpush.bf16.msrb.mxu1 %v1580_v37  ;;  %v1996_v37 = vor.u32 %v2149_v29, %v1995_v26  ;;  %v1792_v40 = vor.u32 %v2098_v33, %v1791_v32  ;;  %v1863_v59 = vld [vmem:[#allocation8 + $0x1b0] sm:$0xf]  ;;  %v1685_v3 = vld [vmem:[#allocation8 + $0x54] sm:$0xf0]  ;;  %v2089_v5 = vld [vmem:[#allocation8 + $0xe0] sm:$0xf0] }
  0x55   :  { %697 = vmatpush.bf16.msrb.mxu2 %v1584_v44  ;;  %v1709_v44 = vld [vmem:[#allocation8 + $0x84] sm:$0xf0]  ;;  %v1959_v62 = vld [vmem:[#allocation8 + $0x270] sm:$0xf]  ;;  %v1755_v4 = vld [vmem:[#allocation8 + $0xd8] sm:$0xf] }
  0x56   :  { %1222 = vmatpush.bf16.msrb.mxu3 %v1672_v53  ;;  %v1712_v51 = vor.u32 %v2076_v43, %v1709_v44  ;;  %v2143_v53 = vld [vmem:[#allocation8 + $0x290] sm:$0xf0]  ;;  %v1947_v10 = vld [vmem:[#allocation8 + $0x258] sm:$0xf]  ;;  %v1756_v12 = vor.u32 %v2089_v5, %v1755_v4  ;;  %v2137_v13 = vld [vmem:[#allocation8 + $0x260] sm:$0xf0] }
  0x57   :  { %672 = vmatpush.bf16.msrb.mxu0 %v1564_v45  ;;  %v1779_v45 = vld [vmem:[#allocation8 + $0x108] sm:$0xf]  ;;  %v2067_v14 = vld [vmem:[#allocation8 + $0x34] sm:$0xf]  ;;  %v1743_v16 = vld [vmem:[#allocation8 + $0xc0] sm:$0xf]  ;;  %v1948_v23 = vor.u32 %v2137_v13, %v1947_v10 }
  0x58   :  { %685 = vmatpush.bf16.msrb.mxu1 %v1568_v52  ;;  %v1780_v52 = vor.u32 %v2095_v46, %v1779_v45  ;;  %v2086_v17 = vld [vmem:[#allocation8 + $0xc8] sm:$0xf0]  ;;  %v1829_v20 = vld [vmem:[#allocation8 + $0x174] sm:$0xf0]  ;;  %v1817_v35 = vld [vmem:[#allocation8 + $0x15c] sm:$0xf0] }
  0x59   :  { %698 = vmatpush.bf16.msrb.mxu2 %v1572_v57  ;;  %v2092_v57 = vld [vmem:[#allocation8 + $0xf8] sm:$0xf0]  ;;  %v2106_v18 = vld [vmem:[#allocation8 + $0x16c] sm:$0xf]  ;;  %v2021_v33 = vld [vmem:[#allocation8 + $0x2f4] sm:$0xf0] }
  0x5a   :  { %1223 = vmatpush.bf16.msrb.mxu3 %v1660_v7  ;;  %v1851_v7 = vld [vmem:[#allocation8 + $0x198] sm:$0xf]  ;;  %v2110_v22 = vld [vmem:[#allocation8 + $0x188] sm:$0xf0]  ;;  %v1832_v30 = vor.u32 %v2106_v18, %v1829_v20  ;;  %v2151_v43 = vld [vmem:[#allocation8 + $0x2d4] sm:$0xf] }
  0x5b   :  { %673 = vmatpush.bf16.msrb.mxu0 %v1552_v61  ;;  %v1972_v61 = vor.u32 %v2143_v53, %v1971_v50  ;;  %v2134_v29 = vld [vmem:[#allocation8 + $0x248] sm:$0xf0]  ;;  %v2009_v44 = vld [vmem:[#allocation8 + $0x2dc] sm:$0xf0]  ;;  %v2100_v45 = vld [vmem:[#allocation8 + $0x13c] sm:$0xf] }
  0x5c   :  { %686 = vmatpush.bf16.msrb.mxu1 %v1556_v1  ;;  %v2140_v1 = vld [vmem:[#allocation8 + $0x278] sm:$0xf0]  ;;  %v2154_v32 = vld [vmem:[#allocation8 + $0x2ec] sm:$0xf]  ;;  %v1805_v46 = vld [vmem:[#allocation8 + $0x144] sm:$0xf0] }
  0x5d   :  { %699 = vmatpush.bf16.msrb.mxu2 %v1560_v8  ;;  %v2113_v8 = vld [vmem:[#allocation8 + $0x1a0] sm:$0xf0]  ;;  %v1960_v9 = vor.u32 %v2140_v1, %v1959_v62  ;;  %v2124_v48 = vld [vmem:[#allocation8 + $0x1fc] sm:$0xf]  ;;  %v1901_v49 = vld [vmem:[#allocation8 + $0x204] sm:$0xf0]  ;;  %v1808_v50 = vor.u32 %v2100_v45, %v1805_v46 }
  0x5e   :  { %674 = vmatmul.bf16.vlgmr.msrb.gmra.mxu0 %v2439_v42  ;;  %1224 = vmatpush.bf16.msrb.mxu3 %v1648_v24  ;;  %v1852_v19 = vor.u32 %v2113_v8, %v1851_v7  ;;  %v2130_v24 = vld [vmem:[#allocation8 + $0x22c] sm:$0xf]  ;;  %v2097_v53 = vld [vmem:[#allocation8 + $0x124] sm:$0xf]  ;;  %v1793_v54 = vld [vmem:[#allocation8 + $0x12c] sm:$0xf0]  ;;  %v1904_v55 = vor.u32 %v2124_v48, %v1901_v49 }
  0x5f   :  { %1230 = vmatpush.bf16.msra.mxu0 %v1828_v0  ;;  %687 = vmatmul.bf16.vlgmr.msrb.gmra.mxu1 %v2439_v42  ;;  %v1768_v0 = vor.u32 %v2092_v57, %v1767_v56  ;;  %v2121_v56 = vld [vmem:[#allocation8 + $0x1e4] sm:$0xf]  ;;  %v1889_v57 = vld [vmem:[#allocation8 + $0x1ec] sm:$0xf0]  ;;  %v2094_v62 = vld [vmem:[#allocation8 + $0x10c] sm:$0xf] }
  0x60   :  { %1243 = vmatpush.bf16.msra.mxu1 %v1924_v6  ;;  %700 = vmatmul.bf16.vlgmr.msrb.gmra.mxu2 %v2439_v42  ;;  %v1984_v42 = vor.u32 %v2146_v41, %v1983_v38  ;;  %v1864_v6 = vor.u32 %v2116_v60, %v1863_v59  ;;  %v2127_v38 = vld [vmem:[#allocation8 + $0x214] sm:$0xf]  ;;  %v1796_v59 = vor.u32 %v2097_v53, %v1793_v54  ;;  %v2145_v60 = vld [vmem:[#allocation8 + $0x2a4] sm:$0xf]  ;;  %v1769_v4 = vld [vmem:[#allocation8 + $0xfc] sm:$0xf0] }
  0x61   :  { %1256 = vmatpush.bf16.msra.mxu2 %v2020_v11  ;;  %v1688_v11 = vor.u32 %v2070_v2, %v1685_v3  ;;  %v2091_v3 = vld [vmem:[#allocation8 + $0xf4] sm:$0xf]  ;;  %v1877_v7 = vld [vmem:[#allocation8 + $0x1d4] sm:$0xf0]  ;;  %v2142_v8 = vld [vmem:[#allocation8 + $0x28c] sm:$0xf] }
  0x62   :  { %1269 = vmatpush.bf16.msra.mxu3 %v1736_v27  ;;  %v1744_v27 = vor.u32 %v2086_v17, %v1743_v16  ;;  %v1772_v5 = vor.u32 %v2091_v3, %v1769_v4  ;;  %v1973_v10 = vld [vmem:[#allocation8 + $0x294] sm:$0xf0]  ;;  %v1661_v13 = vld [vmem:[#allocation8 + $0x24] sm:$0xf0]  ;;  %v2115_v18 = vld [vmem:[#allocation8 + $0x1b4] sm:$0xf] }
  0x63   :  { %1231 = vmatpush.bf16.msra.mxu0 %v1816_v15  ;;  %v1673_v15 = vld [vmem:[#allocation8 + $0x3c] sm:$0xf0]  ;;  %v1757_v16 = vld [vmem:[#allocation8 + $0xe4] sm:$0xf0]  ;;  %v2139_v20 = vld [vmem:[#allocation8 + $0x274] sm:$0xf] }
  0x64   :  { %1244 = vmatpush.bf16.msra.mxu1 %v1912_v21  ;;  %v1839_v21 = vld [vmem:[#allocation8 + $0x180] sm:$0xf]  ;;  %v1676_v26 = vor.u32 %v2067_v14, %v1673_v15  ;;  %v2088_v14 = vld [vmem:[#allocation8 + $0xdc] sm:$0xf]  ;;  %v1739_v49 = vld [vmem:[#allocation8 + $0xb0] sm:$0xf] }
  0x65   :  { %1257 = vmatpush.bf16.msra.mxu2 %v2008_v25  ;;  %v1925_v25 = vld [vmem:[#allocation8 + $0x234] sm:$0xf0]  ;;  %v1840_v31 = vor.u32 %v2110_v22, %v1839_v21  ;;  %v1760_v17 = vor.u32 %v2088_v14, %v1757_v16  ;;  %v1961_v22 = vld [vmem:[#allocation8 + $0x27c] sm:$0xf0]  ;;  %v2078_v14 = vld [vmem:[#allocation8 + $0x88] sm:$0xf0] }
  0x66   :  { %1270 = vmatpush.bf16.msra.mxu3 %v1724_v39  ;;  %v1928_v36 = vor.u32 %v2130_v24, %v1925_v25  ;;  %v1913_v39 = vld [vmem:[#allocation8 + $0x21c] sm:$0xf0]  ;;  %v2061_v24 = vld [vmem:[#allocation8 + $0x4] sm:$0xf]  ;;  %v1649_v25 = vld [vmem:[#allocation8 + $0xc] sm:$0xf0] }
  0x67   :  { %1232 = vmatpush.bf16.msra.mxu0 %v1804_v28  ;;  %v1935_v28 = vld [vmem:[#allocation8 + $0x240] sm:$0xf]  ;;  %s1408_s11 = sshll.u32 %s2481_s7, 4  ;;  %s1409_s11 = int_to_ptr.hbm [resolvable:$true] %s1408_s11 }
  0x68   :  { %1245 = vmatpush.bf16.msra.mxu1 %v1900_v34  ;;  %v2103_v34 = vld [vmem:[#allocation8 + $0x154] sm:$0xf]  ;;  %v1811_v16 = vld [vmem:[#allocation8 + $0x140] sm:$0xf] }
  0x69   :  { %1258 = vmatpush.bf16.msra.mxu2 %v1996_v37  ;;  %v1936_v37 = vor.u32 %v2134_v29, %v1935_v28  ;;  %v1820_v41 = vor.u32 %v2103_v34, %v1817_v35  ;;  %v1745_v28 = vld [vmem:[#allocation8 + $0xcc] sm:$0xf0]  ;;  %v1949_v34 = vld [vmem:[#allocation8 + $0x264] sm:$0xf0] }
  0x6a   :  { %1271 = vmatpush.bf16.msra.mxu3 %v1712_v51  ;;  %v2148_v51 = vld [vmem:[#allocation8 + $0x2bc] sm:$0xf] }
  0x6b   :  { %1233 = vmatpush.bf16.msra.mxu0 %v1792_v40  ;;  %v2024_v40 = vor.u32 %v2154_v32, %v2021_v33  ;;  %v2136_v33 = vld [vmem:[#allocation8 + $0x25c] sm:$0xf] }
  0x6c   :  { %1246 = vmatpush.bf16.msra.mxu1 %v1888_v47  ;;  %v1916_v47 = vor.u32 %v2127_v38, %v1913_v39  ;;  %v1952_v35 = vor.u32 %v2136_v33, %v1949_v34  ;;  %v2133_v39 = vld [vmem:[#allocation8 + $0x244] sm:$0xf] }
  0x6d   :  { %1259 = vmatpush.bf16.msra.mxu2 %v1984_v42  ;;  %v2012_v42 = vor.u32 %v2151_v43, %v2009_v44  ;;  %v148_v43 = vld [vmem:[#allocation7] sm:$0xf] }
  0x6e   :  { %1272 = vmatpush.bf16.msra.mxu3 %v1700_v63  ;;  %v1781_v63 = vld [vmem:[#allocation8 + $0x114] sm:$0xf0]  ;;  %v150_v44 = vperm.slane %v148_v43, 0  ;;  %v151_v45 = vperm.slane %v148_v43, 1 }
  0x6f   :  { %1234 = vmatpush.bf16.msra.mxu0 %v1780_v52  ;;  %v1997_v52 = vld [vmem:[#allocation8 + $0x2c4] sm:$0xf0]  ;;  %v1784_v2 = vor.u32 %v2094_v62, %v1781_v63  ;;  %v1823_v63 = vld [vmem:[#allocation8 + $0x158] sm:$0xf] }
  0x70   :  { %1247 = vmatpush.bf16.msra.mxu1 %v1876_v58  ;;  %v2000_v58 = vor.u32 %v2148_v51, %v1997_v52  ;;  %v1835_v51 = vld [vmem:[#allocation8 + $0x170] sm:$0xf]  ;;  %v2108_v52 = vld [vmem:[#allocation8 + $0x178] sm:$0xf0] }
  0x71   :  { %1260 = vmatpush.bf16.msra.mxu2 %v1972_v61  ;;  %v1985_v61 = vld [vmem:[#allocation8 + $0x2ac] sm:$0xf0] }
  0x72   :  { %1273 = vmatpush.bf16.msra.mxu3 %v1688_v11  ;;  %v1988_v1 = vor.u32 %v2145_v60, %v1985_v61  ;;  %v1976_v11 = vor.u32 %v2142_v8, %v1973_v10  ;;  %v1727_v60 = vld [vmem:[#allocation8 + $0x98] sm:$0xf]  ;;  %v2081_v61 = vld [vmem:[#allocation8 + $0xa0] sm:$0xf0]  ;;  %v2027_v8 = vld [vmem:[#allocation8 + $0x2f0] sm:$0xf] }
  0x73   :  { %1235 = vmatpush.bf16.msra.mxu0 %v1768_v0  ;;  %v1892_v0 = vor.u32 %v2121_v56, %v1889_v57 }
  0x74   :  { %1248 = vmatpush.bf16.msra.mxu1 %v1864_v6  ;;  %v2118_v6 = vld [vmem:[#allocation8 + $0x1cc] sm:$0xf] }
  0x75   :  { %1261 = vmatpush.bf16.msra.mxu2 %v1960_v9  ;;  %v1880_v9 = vor.u32 %v2118_v6, %v1877_v7  ;;  %v1931_v6 = vld [vmem:[#allocation8 + $0x230] sm:$0xf]  ;;  %v2132_v7 = vld [vmem:[#allocation8 + $0x238] sm:$0xf0] }
  0x76   :  { %1274 = vmatpush.bf16.msra.mxu3 %v1676_v26  ;;  %v1652_v26 = vor.u32 %v2061_v24, %v1649_v25  ;;  %v2129_v24 = vld [vmem:[#allocation8 + $0x220] sm:$0xf0]  ;;  %v2015_v25 = vld [vmem:[#allocation8 + $0x2d8] sm:$0xf] }
  0x77   :  { %1236 = vmatpush.bf16.msra.mxu0 %v1756_v12  ;;  %v2064_v12 = vld [vmem:[#allocation8 + $0x1c] sm:$0xf] }
  0x78   :  { %1249 = vmatpush.bf16.msra.mxu1 %v1852_v19  ;;  %v1664_v15 = vor.u32 %v2064_v12, %v1661_v13  ;;  %v1865_v19 = vld [vmem:[#allocation8 + $0x1bc] sm:$0xf0]  ;;  %v2156_v12 = vld [vmem:[#allocation8 + $0x2f8] sm:$0xf0] }
  0x79   :  { %1262 = vmatpush.bf16.msra.mxu2 %v1948_v23  ;;  %v1868_v21 = vor.u32 %v2115_v18, %v1865_v19  ;;  %v1964_v23 = vor.u32 %v2139_v20, %v1961_v22  ;;  %v1715_v13 = vld [vmem:[#allocation8 + $0x80] sm:$0xf]  ;;  %v1932_v19 = vor.u32 %v2132_v7, %v1931_v6  ;;  %v2066_v6 = vld [vmem:[#allocation8 + $0x28] sm:$0xf0] }
  0x7a   :  { %1275 = vmatpush.bf16.msra.mxu3 %v1664_v15  ;;  %v1716_v22 = vor.u32 %v2078_v14, %v1715_v13  ;;  %v1763_v7 = vld [vmem:[#allocation8 + $0xe0] sm:$0xf] }
  0x7b   :  { %1237 = vmatpush.bf16.msra.mxu0 %v1744_v27  ;;  %v2085_v27 = vld [vmem:[#allocation8 + $0xc4] sm:$0xf] }
  0x7c   :  { %1250 = vmatpush.bf16.msra.mxu1 %v1840_v31  ;;  %v1748_v29 = vor.u32 %v2085_v27, %v1745_v28  ;;  %v1853_v31 = vld [vmem:[#allocation8 + $0x1a4] sm:$0xf0]  ;;  %v2153_v28 = vld [vmem:[#allocation8 + $0x2e0] sm:$0xf0] }
  0x7d   :  { %1263 = vmatpush.bf16.msra.mxu2 %v1936_v37  ;;  %v1841_v37 = vld [vmem:[#allocation8 + $0x18c] sm:$0xf0] }
  0x7e   :  { %1276 = vmatpush.bf16.msra.mxu3 %v1652_v26 }
  0x7f   :  { %1282 = vmatpush.bf16.msrb.mxu0 %v1832_v30  ;;  %v2112_v30 = vld [vmem:[#allocation8 + $0x19c] sm:$0xf] }
  0x80   :  { %1295 = vmatpush.bf16.msrb.mxu1 %v1928_v36  ;;  %v1856_v32 = vor.u32 %v2112_v30, %v1853_v31  ;;  %v2109_v36 = vld [vmem:[#allocation8 + $0x184] sm:$0xf]  ;;  %v2075_v30 = vld [vmem:[#allocation8 + $0x70] sm:$0xf0]  ;;  %v1799_v31 = vld [vmem:[#allocation8 + $0x128] sm:$0xf] }
  0x81   :  { %1308 = vmatpush.bf16.msrb.mxu2 %v2024_v40  ;;  %v1844_v38 = vor.u32 %v2109_v36, %v1841_v37  ;;  %v1937_v40 = vld [vmem:[#allocation8 + $0x24c] sm:$0xf0]  ;;  %v2016_v36 = vor.u32 %v2153_v28, %v2015_v25  ;;  %v2114_v28 = vld [vmem:[#allocation8 + $0x1a8] sm:$0xf0] }
  0x83   :  { %1283 = vmatpush.bf16.msrb.mxu0 %v1820_v41  ;;  %v1940_v41 = vor.u32 %v2133_v39, %v1937_v40  ;;  %v2126_v39 = vld [vmem:[#allocation8 + $0x208] sm:$0xf0] }
  0x84   :  { %1296 = vmatpush.bf16.msrb.mxu1 %v1916_v47 }
  0x85   :  { %1309 = vmatpush.bf16.msrb.mxu2 %v2012_v42  ;;  %v2084_v42 = vld [vmem:[#allocation8 + $0xb8] sm:$0xf0] }
  0x86   :  { %v1740_v56 = vor.u32 %v2084_v42, %v1739_v49  ;;  %v1895_v42 = vld [vmem:[#allocation8 + $0x1e8] sm:$0xf] }
  0x87   :  { %1284 = vmatpush.bf16.msrb.mxu0 %v1808_v50 }
  0x88   :  { %1297 = vmatpush.bf16.msrb.mxu1 %v1904_v55  ;;  %v152_v55 = vperm.slane %v148_v43, 2 }
  0x89   :  { %1310 = vmatpush.bf16.msrb.mxu2 %v2000_v58  ;;  %v153_v58 = vperm.slane %v148_v43, 3  ;;  %v2150_v43 = vld [vmem:[#allocation8 + $0x2c8] sm:$0xf0] }
  0x8b   :  { %1285 = vmatpush.bf16.msrb.mxu0 %v1796_v59  ;;  %v1836_v59 = vor.u32 %v2108_v52, %v1835_v51 }
  0x8c   :  { %1298 = vmatpush.bf16.msrb.mxu1 %v1892_v0  ;;  %v2105_v0 = vld [vmem:[#allocation8 + $0x160] sm:$0xf0] }
  0x8d   :  { %1311 = vmatpush.bf16.msrb.mxu2 %v1988_v1 }
  0x8f   :  { %1286 = vmatpush.bf16.msrb.mxu0 %v1784_v2 }
  0x90   :  { %1299 = vmatpush.bf16.msrb.mxu1 %v1880_v9 }
  0x91   :  { %1312 = vmatpush.bf16.msrb.mxu2 %v1976_v11  ;;  %v1824_v11 = vor.u32 %v2105_v0, %v1823_v63  ;;  %v1883_v63 = vld [vmem:[#allocation8 + $0x1d0] sm:$0xf]  ;;  %v2120_v0 = vld [vmem:[#allocation8 + $0x1d8] sm:$0xf0] }
  0x93   :  { %1287 = vmatpush.bf16.msrb.mxu0 %v1772_v5  ;;  %v1728_v5 = vor.u32 %v2081_v61, %v1727_v60 }
  0x94   :  { %1300 = vmatpush.bf16.msrb.mxu1 %v1868_v21  ;;  %v2028_v21 = vor.u32 %v2156_v12, %v2027_v8  ;;  %v2090_v8 = vld [vmem:[#allocation8 + $0xe8] sm:$0xf0]  ;;  %v2117_v12 = vld [vmem:[#allocation8 + $0x1c0] sm:$0xf0] }
  0x95   :  { %1313 = vmatpush.bf16.msrb.mxu2 %v1964_v23  ;;  %v1919_v23 = vld [vmem:[#allocation8 + $0x218] sm:$0xf]  ;;  %v1764_v14 = vor.u32 %v2090_v8, %v1763_v7 }
  0x96   :  { %v1920_v34 = vor.u32 %v2129_v24, %v1919_v23 }
  0x97   :  { %1288 = vmatpush.bf16.msrb.mxu0 %v1760_v17  ;;  %v2102_v17 = vld [vmem:[#allocation8 + $0x148] sm:$0xf0] }
  0x98   :  { %1301 = vmatpush.bf16.msrb.mxu1 %v1856_v32  ;;  %v1812_v27 = vor.u32 %v2102_v17, %v1811_v16  ;;  %v2099_v32 = vld [vmem:[#allocation8 + $0x130] sm:$0xf0]  ;;  %v2141_v16 = vld [vmem:[#allocation8 + $0x280] sm:$0xf0]  ;;  %v1655_v17 = vld [vmem:[#allocation8 + $0x8] sm:$0xf] }
  0x99   :  { %1314 = vmatpush.bf16.msrb.mxu2 %v1952_v35  ;;  %v1800_v40 = vor.u32 %v2099_v32, %v1799_v31  ;;  %v1955_v31 = vld [vmem:[#allocation8 + $0x260] sm:$0xf]  ;;  %v2138_v32 = vld [vmem:[#allocation8 + $0x268] sm:$0xf0] }
  0x9b   :  { %1289 = vmatpush.bf16.msrb.mxu0 %v1748_v29  ;;  %v1703_v29 = vld [vmem:[#allocation8 + $0x68] sm:$0xf] }
  0x9c   :  { %1302 = vmatpush.bf16.msrb.mxu1 %v1844_v38  ;;  %v1704_v37 = vor.u32 %v2075_v30, %v1703_v29  ;;  %v1907_v38 = vld [vmem:[#allocation8 + $0x200] sm:$0xf] }
  0x9d   :  { %1315 = vmatpush.bf16.msrb.mxu2 %v1940_v41  ;;  %v2003_v41 = vld [vmem:[#allocation8 + $0x2c0] sm:$0xf] }
  0x9e   :  { %v2004_v49 = vor.u32 %v2150_v43, %v2003_v41 }
  0xbb   :  { %v327_v46 = vpop.f32.mrf.mxu0 }
  0xbc   :  { %v328_v47 = vadd.f32 %v327_v46, %v150_v44  ;;  %v340_v48 = vpop.f32.mrf.mxu1  ;;  %v1691_v44 = vld [vmem:[#allocation8 + $0x50] sm:$0xf] }
  0xbd   :  { %v341_v50 = vadd.f32 %v340_v48, %v151_v45  ;;  %v2072_v45 = vld [vmem:[#allocation8 + $0x58] sm:$0xf0]  ;;  %v1787_v46 = vld [vmem:[#allocation8 + $0x110] sm:$0xf]  ;;  %v1908_v48 = vor.u32 %v2126_v39, %v1907_v38  ;;  %v2135_v38 = vld [vmem:[#allocation8 + $0x250] sm:$0xf0] }
  0xbe   :  { %v370_v53 = vmax.f32 %v328_v47, 0.0  ;;  %v2096_v47 = vld [vmem:[#allocation8 + $0x118] sm:$0xf0]  ;;  %v1692_v51 = vor.u32 %v2072_v45, %v1691_v44 }
  0xbf   :  { %v371_v54 = vmax.f32 %v341_v50, 0.0  ;;  %v2123_v50 = vld [vmem:[#allocation8 + $0x1f0] sm:$0xf0]  ;;  %v1788_v52 = vor.u32 %v2096_v47, %v1787_v46 }
  0xc0   :  { %v2448_v57 = vpack.c.bf16 %v370_v53, %v370_v53  ;;  %v1991_v53 = vld [vmem:[#allocation8 + $0x2a8] sm:$0xf]  ;;  %v1896_v60 = vor.u32 %v2123_v50, %v1895_v42 }
  0xc1   :  { %v2450_v62 = vpack.c.bf16 %v371_v54, %v371_v54  ;;  %v2147_v54 = vld [vmem:[#allocation8 + $0x2b0] sm:$0xf0] }
  0xc2   :  { %1225 = vmatmul.bf16.vlgmr.msrb.gmra.mxu3 %v2448_v57  ;;  %v1992_v61 = vor.u32 %v2147_v54, %v1991_v53 }
  0xc3   :  { %v353_v1 = vpop.f32.mrf.mxu2  ;;  %1238 = vmatmul.bf16.vlgmr.msra.gmra.mxu0 %v2450_v62  ;;  %v329_v4 = vpop.f32.mrf.mxu0  ;;  %1321 = vmatpush.bf16.msrb.mxu3 %v1740_v56  ;;  %v2069_v56 = vld [vmem:[#allocation8 + $0x40] sm:$0xf0] }
  0xc4   :  { %v354_v2 = vadd.f32 %v353_v1, %v152_v55  ;;  %v366_v3 = vpop.f32.mrf.mxu3  ;;  %v342_v10 = vpop.f32.mrf.mxu1  ;;  %1334 = vmatpush.bf16.msra.mxu0 %v1836_v59  ;;  %v1679_v55 = vld [vmem:[#allocation8 + $0x38] sm:$0xf]  ;;  %v2093_v59 = vld [vmem:[#allocation8 + $0x100] sm:$0xf0]  ;;  %v2144_v4 = vld [vmem:[#allocation8 + $0x298] sm:$0xf0] }
  0xc5   :  { %v367_v9 = vadd.f32 %v366_v3, %v153_v58  ;;  %v1775_v58 = vld [vmem:[#allocation8 + $0xf8] sm:$0xf]  ;;  %v1680_v1 = vor.u32 %v2069_v56, %v1679_v55  ;;  %v1979_v3 = vld [vmem:[#allocation8 + $0x290] sm:$0xf] }
  0xc6   :  { %v372_v15 = vmax.f32 %v354_v2, 0.0  ;;  %v1776_v2 = vor.u32 %v2093_v59, %v1775_v58  ;;  %v1980_v10 = vor.u32 %v2144_v4, %v1979_v3 }
  0xc7   :  { %v373_v18 = vmax.f32 %v367_v9, 0.0  ;;  %1322 = vmatpush.bf16.msrb.mxu3 %v1728_v5  ;;  %v1667_v5 = vld [vmem:[#allocation8 + $0x20] sm:$0xf]  ;;  %v1884_v9 = vor.u32 %v2120_v0, %v1883_v63 }
  0xc8   :  { %v2454_v20 = vpack.c.bf16 %v372_v15, %v372_v15  ;;  %1335 = vmatpush.bf16.msra.mxu0 %v1824_v11  ;;  %v1871_v11 = vld [vmem:[#allocation8 + $0x1b8] sm:$0xf]  ;;  %v1668_v13 = vor.u32 %v2066_v6, %v1667_v5 }
  0xc9   :  { %v2456_v26 = vpack.c.bf16 %v373_v18, %v373_v18  ;;  %v1967_v15 = vld [vmem:[#allocation8 + $0x278] sm:$0xf]  ;;  %v2063_v18 = vld [vmem:[#allocation8 + $0x10] sm:$0xf0]  ;;  %v1872_v23 = vor.u32 %v2117_v12, %v1871_v11 }
  0xca   :  { %1251 = vmatmul.bf16.vlgmr.msra.gmra.mxu1 %v2454_v20  ;;  %v1968_v25 = vor.u32 %v2141_v16, %v1967_v15  ;;  %v1656_v29 = vor.u32 %v2063_v18, %v1655_v17 }
  0xcb   :  { %1264 = vmatmul.bf16.vlgmr.msra.gmra.mxu2 %v2456_v26  ;;  %v355_v33 = vpop.f32.mrf.mxu2  ;;  %1347 = vmatpush.bf16.msra.mxu1 %v1932_v19  ;;  %v1751_v19 = vld [vmem:[#allocation8 + $0xc8] sm:$0xf] }
  0xcc   :  { %v368_v35 = vpop.f32.mrf.mxu3  ;;  %1360 = vmatpush.bf16.msra.mxu2 %v2028_v21  ;;  %1323 = vmatpush.bf16.msrb.mxu3 %v1716_v22  ;;  %v2087_v21 = vld [vmem:[#allocation8 + $0xd0] sm:$0xf0] }
  0xcd   :  { %1336 = vmatpush.bf16.msra.mxu0 %v1812_v27  ;;  %v1859_v27 = vld [vmem:[#allocation8 + $0x1a0] sm:$0xf]  ;;  %v1752_v30 = vor.u32 %v2087_v21, %v1751_v19  ;;  %v1847_v35 = vld [vmem:[#allocation8 + $0x188] sm:$0xf] }
  0xce   :  { %v1860_v33 = vor.u32 %v2114_v28, %v1859_v27 }
  0xcf   :  { %1348 = vmatpush.bf16.msra.mxu1 %v1920_v34  ;;  %v1956_v34 = vor.u32 %v2138_v32, %v1955_v31 }
  0xd0   :  { %1361 = vmatpush.bf16.msra.mxu2 %v2016_v36  ;;  %1324 = vmatpush.bf16.msrb.mxu3 %v1704_v37  ;;  %v2111_v36 = vld [vmem:[#allocation8 + $0x190] sm:$0xf0]  ;;  %v1943_v37 = vld [vmem:[#allocation8 + $0x248] sm:$0xf] }
  0xd1   :  { %1337 = vmatpush.bf16.msra.mxu0 %v1800_v40  ;;  %v1848_v40 = vor.u32 %v2111_v36, %v1847_v35  ;;  %v1944_v44 = vor.u32 %v2135_v38, %v1943_v37 }
  0xd2   :  { %1277 = vmatmul.bf16.vlgmr.msra.gmra.mxu3 %v2448_v57 }
  0xd3   :  { %1349 = vmatpush.bf16.msra.mxu1 %v1908_v48  ;;  %1290 = vmatmul.bf16.vlgmr.msrb.gmra.mxu0 %v2450_v62 }
  0xd4   :  { %1362 = vmatpush.bf16.msra.mxu2 %v2004_v49  ;;  %1325 = vmatpush.bf16.msrb.mxu3 %v1692_v51 }
  0xd5   :  { %1338 = vmatpush.bf16.msra.mxu0 %v1788_v52 }
  0xd7   :  { %1350 = vmatpush.bf16.msra.mxu1 %v1896_v60 }
  0xd8   :  { %1363 = vmatpush.bf16.msra.mxu2 %v1992_v61  ;;  %1326 = vmatpush.bf16.msrb.mxu3 %v1680_v1  ;;  %v1373_v1 = vld [vmem:[%s2479_s5] sm:$0x7]  ;;  %s2380_s5 = smov [#allocation13]  }
  0xd9   :  { %1339 = vmatpush.bf16.msra.mxu0 %v1776_v2  ;;  %v1376_v3 = vperm.slane %v1373_v1, 1  ;;  %v1375_v6 = vperm.slane %v1373_v1, 0  ;;  %v1377_v18 = vperm.slane %v1373_v1, 2  ;;  %s1406_s8 = sshll.u32 %s2380_s5, 4  ;;  %s1407_s8 = int_to_ptr.vmem [resolvable:$true] %s1406_s8 }
  0xda   :  { %1303 = vmatmul.bf16.vlgmr.msrb.gmra.mxu1 %v2454_v20 }
  0xdb   :  { %v675_v22 = vpop.f32.mrf.mxu0  ;;  %1316 = vmatmul.bf16.vlgmr.msrb.gmra.mxu2 %v2456_v26  ;;  %1351 = vmatpush.bf16.msra.mxu1 %v1884_v9 }
  0xdc   :  { %v688_v24 = vpop.f32.mrf.mxu1  ;;  %1364 = vmatpush.bf16.msra.mxu2 %v1980_v10  ;;  %1327 = vmatpush.bf16.msrb.mxu3 %v1668_v13 }
  0xdd   :  { %1340 = vmatpush.bf16.msra.mxu0 %v1764_v14  ;;  %v1387_v14 = vld [vmem:[#allocation11] sm:$0x7] }
  0xde   :  { %v1390_v17 = vperm.slane %v1387_v14, 1 }
  0xdf   :  { %1352 = vmatpush.bf16.msra.mxu1 %v1872_v23 }
  0xe0   :  { %1365 = vmatpush.bf16.msra.mxu2 %v1968_v25  ;;  %1328 = vmatpush.bf16.msrb.mxu3 %v1656_v29  ;;  %v1391_v29 = vperm.slane %v1387_v14, 2 }
  0xe1   :  { %1341 = vmatpush.bf16.msra.mxu0 %v1752_v30 }
  0xe3   :  { %v677_v39 = vpop.f32.mrf.mxu0  ;;  %1353 = vmatpush.bf16.msra.mxu1 %v1860_v33  ;;  %v701_v41 = vpop.f32.mrf.mxu2  ;;  %1329 = vmatmul.bf16.vlgmr.msrb.gmra.mxu3 %v2448_v57 }
  0xe4   :  { %v690_v43 = vpop.f32.mrf.mxu1  ;;  %1366 = vmatpush.bf16.msra.mxu2 %v1956_v34  ;;  %1342 = vmatmul.bf16.vlgmr.msra.gmra.mxu0 %v2450_v62 }
  0xe7   :  { %1354 = vmatpush.bf16.msra.mxu1 %v1848_v40 }
  0xe8   :  { %1367 = vmatpush.bf16.msra.mxu2 %v1944_v44 }
  0xea   :  { %1355 = vmatmul.bf16.vlgmr.msra.gmra.mxu1 %v2454_v20 }
  0xeb   :  { %1368 = vmatmul.bf16.vlgmr.msra.gmra.mxu2 %v2456_v26  ;;  %v703_v45 = vpop.f32.mrf.mxu2 }
 0x140   :  { %v1239_v46 = vpop.f32.mrf.mxu0 }
 0x145   :  { %v1226_v47 = vpop.f32.mrf.mxu3 }
 0x146   :  { %v1227_v56 = vadd.f32 %v1226_v47, %v675_v22  ;;  %v1389_v22 = vperm.slane %v1387_v14, 0 }
 0x147   :  { %v1252_v48 = vpop.f32.mrf.mxu1 }
 0x148   :  { %v1241_v49 = vpop.f32.mrf.mxu0  ;;  %v1240_v60 = vadd.f32 %v1239_v46, %v1227_v56 }
 0x14a   :  { %v1253_v0 = vadd.f32 %v1252_v48, %v1240_v60 }
 0x14d   :  { %v1228_v50 = vpop.f32.mrf.mxu3 }
 0x14e   :  { %v1265_v42 = vpop.f32.mrf.mxu2 }
 0x14f   :  { %v1254_v51 = vpop.f32.mrf.mxu1  ;;  %v1266_v5 = vadd.f32 %v1265_v42, %v1253_v0 }
 0x150   :  { %v1291_v52 = vpop.f32.mrf.mxu0 }
 0x151   :  { %v1381_v13 = vadd.f32 %v1375_v6, %v1266_v5 }
 0x153   :  { %v1384_v21 = vmax.f32 %v1381_v13, 0.0 }
 0x155   :  { %v1278_v57 = vpop.f32.mrf.mxu3  ;;  %v1395_v30 = vmul.f32 %v1389_v22, %v1384_v21 }
 0x156   :  { %v1267_v53 = vpop.f32.mrf.mxu2  ;;  %v1279_v55 = vadd.f32 %v1278_v57, %v688_v24 }
 0x157   :  { %v1304_v54 = vpop.f32.mrf.mxu1 }
 0x158   :  { %v1293_v62 = vpop.f32.mrf.mxu0  ;;  %v1292_v58 = vadd.f32 %v1291_v52, %v1279_v55 }
 0x15a   :  { %v1305_v61 = vadd.f32 %v1304_v54, %v1292_v58 }
 0x15d   :  { %v1280_v20 = vpop.f32.mrf.mxu3 }
 0x15e   :  { %v1317_v59 = vpop.f32.mrf.mxu2 }
 0x15f   :  { %v1306_v26 = vpop.f32.mrf.mxu1  ;;  %v1318_v2 = vadd.f32 %v1317_v59, %v1305_v61 }
 0x161   :  { %v1343_v63 = vpop.f32.mrf.mxu0  ;;  %v1382_v10 = vadd.f32 %v1376_v3, %v1318_v2 }
 0x163   :  { %v1385_v16 = vmax.f32 %v1382_v10, 0.0 }
 0x165   :  { %v1396_v27 = vmul.f32 %v1390_v17, %v1385_v16 }
 0x166   :  { %v1319_v4 = vpop.f32.mrf.mxu2  ;;  %v1330_v7 = vpop.f32.mrf.mxu3 }
 0x167   :  { %v1356_v8 = vpop.f32.mrf.mxu1  ;;  %v1331_v9 = vadd.f32 %v1330_v7, %v701_v41  ;;  %v1398_v32 = vadd.f32 %v1396_v27, %v1395_v30 }
 0x169   :  { %v1344_v11 = vadd.f32 %v1343_v63, %v1331_v9  ;;  %v1345_v12 = vpop.f32.mrf.mxu0 }
 0x16b   :  { %v1357_v15 = vadd.f32 %v1356_v8, %v1344_v11 }
 0x16e   :  { %v1369_v19 = vpop.f32.mrf.mxu2  ;;  %v1332_v24 = vpop.f32.mrf.mxu3 }
 0x16f   :  { %v1370_v23 = vadd.f32 %v1369_v19, %v1357_v15  ;;  %v1358_v25 = vpop.f32.mrf.mxu1 }
 0x171   :  { %v1383_v28 = vadd.f32 %v1377_v18, %v1370_v23 }
 0x173   :  { %v1386_v31 = vmax.f32 %v1383_v28, 0.0 }
 0x175   :  { %v1397_v33 = vmul.f32 %v1391_v29, %v1386_v31 }
 0x176   :  { %v1371_v34 = vpop.f32.mrf.mxu2 }
 0x177   :  { %v1399_v35 = vadd.f32 %v1398_v32, %v1397_v33 }
 0x179   :  { %1400 = vst [vmem:[#allocation13] sm:$0xff] %v1399_v35 }
 0x17a   :  { %1411 = dma.vmem_to_hbm [thread:$0]  %s1407_s8, 128, %s1409_s11, [#allocation4]  }
 0x17b   :  { %2368 = dma.done.wait [#allocation4], 128  }
 0x17c   :  { %2369 = vsyncadd [#allocation4], 4294967168 }
 0x17d   :  { %1416 = vsyncpa [#allocation3], 1 }
 0x17e   :  { %1417 = vsyncpa [#allocation6], 1 }
 0x17f   :  { %1418 = vsyncpa [#allocation9], 1 }
 0x180   :  { %1419 = vsyncpa [#allocation12], 1 }
 0x181   :  { %1420 = vsyncpa [#allocation4], 1 }

</bundles_post_ra>
